<compile_context>
chip_gen: v7x
topology: tpu7x:2x2x1
jax: 0.10.0
libtpu: 0.0.40
codegen_flags: <defaults>
</compile_context>

<pallas_src>
import functools

import jax
import jax.numpy as jnp
from jax.experimental import pallas as pl
from jax.experimental.pallas import tpu as pltpu

LANES = 128
# 8192 rows x 128 lanes x 4 B = 4 MiB per f32 block; 2 inputs x 2 pipeline
# buffers = 16 MiB of VMEM, comfortably below physical VMEM on every
# generation (v7x: 64 MiB per TC) while making per-step DMA >> fixed overhead.
MAX_ROW_TILE = 8192
# 16 MiB of input buffers exceeds v5e's 16 MiB *default* scoped-VMEM limit,
# so raise it explicitly (still far below physical VMEM on all chips).
VMEM_LIMIT_BYTES = 32 * 1024 * 1024


def _num_chunks_for_device():
    """One partial-sum chunk per TensorCore: 2 on v7x, 1 on v5e/v6e."""
    # TODO(synk): on v7x, verify the "parallel" chunk axis really shards across
    # the two TensorCores; if profiling shows one core doing all steps, switch
    # this axis to pltpu.CORE_PARALLEL.
    try:
        kind = jax.devices()[0].device_kind.lower()
    except Exception:
        return 1
    return 2 if "v7" in kind else 1


def _elementwise_error(p, g, gan_type):
    """Per-element loss in f32 (MSE for 'ls', PyTorch-clamped BCE for 'bce')."""
    if gan_type == "ls":
        d = p - g
        return d * d
    # nn.BCELoss (reduction='mean'); PyTorch clamps each log term at -100.
    logp = jnp.maximum(jnp.log(p), -100.0)
    log1mp = jnp.maximum(jnp.log(1.0 - p), -100.0)
    return -(g * logp + (1.0 - g) * log1mp)


def _loss_kernel(pred_ref, gt_ref, out_ref, *, gan_type, row_tile, valid_rows,
                 steps_per_chunk, num_full_blocks, needs_mask):
    c = pl.program_id(0)   # chunk (one resident partial per TensorCore on v7x)
    i = pl.program_id(1)   # row-block within chunk (reduction axis)

    @pl.when(i == 0)
    def _():
        out_ref[...] = jnp.zeros_like(out_ref)

    logical_block = c * steps_per_chunk + i

    def compute():
        p = pred_ref[...].astype(jnp.float32)
        g = gt_ref[...].astype(jnp.float32)
        return _elementwise_error(p, g, gan_type)

    def accumulate(err):
        # Resident (8, 128) accumulator: pure VPU adds every step; the single
        # cross-lane reduce happens once in the wrapper.
        if row_tile % 8 == 0:
            out_ref[...] += err.reshape(row_tile // 8, 8, LANES).sum(axis=0)
        else:
            # Only reachable when the whole input is a single block whose row
            # count isn't a multiple of 8 (tiny inputs); one-off XLU reduce.
            out_ref[0:1, :] += err.sum(axis=0, keepdims=True)

    if not needs_mask:
        # Every grid step maps to a fully valid block: no iota/compare/select.
        accumulate(compute())
    else:
        @pl.when(logical_block < num_full_blocks)
        def _():  # interior (fully valid) block: unmasked fast path
            accumulate(compute())

        @pl.when(logical_block >= num_full_blocks)
        def _():
            # Partial boundary block, or a clamped re-read step of the last
            # chunk: rows at/after `valid_rows` contribute exactly zero.
            # NaN/Inf from log() of padding garbage lives only in discarded
            # select lanes.  (int32 iota: fine below ~2^31 rows ~ 1 TB f32.)
            err = compute()
            row_ids = (jax.lax.broadcasted_iota(jnp.int32, (row_tile, LANES), 0)
                       + logical_block * row_tile)
            accumulate(jnp.where(row_ids < valid_rows, err, 0.0))


def gan_loss(pred, gt, gan_type="ls", *, max_row_tile=MAX_ROW_TILE,
             num_chunks=None):
    """Mean MSE ('ls') / BCE ('bce') over all elements, computed in Pallas."""
    if gan_type not in ("ls", "bce"):
        raise ValueError(f"gan loss type: {gan_type} not defined")
    assert pred.shape == gt.shape, "pred / gt must match (nn.MSELoss / nn.BCELoss)"
    n = pred.size

    flat_p = pred.reshape(-1)
    flat_g = gt.reshape(-1)
    rows = n // LANES
    tail = n - rows * LANES

    total = jnp.zeros((), jnp.float32)

    if rows > 0:
        if tail:
            # 128-aligned prefix; the <128-element tail is added below in
            # plain jnp (avoids padding both full arrays in HBM).
            p2d = flat_p[: rows * LANES].reshape(rows, LANES)
            g2d = flat_g[: rows * LANES].reshape(rows, LANES)
        else:
            p2d = flat_p.reshape(rows, LANES)   # free view of contiguous data
            g2d = flat_g.reshape(rows, LANES)

        # Biggest tile that fits comfortably in VMEM; a single-block input
        # uses its exact extent (block == full array dims is always legal).
        row_tile = rows if rows <= max_row_tile else max_row_tile
        total_blocks = -(-rows // row_tile)

        if num_chunks is None:
            num_chunks = _num_chunks_for_device()
        num_chunks = max(1, min(int(num_chunks), total_blocks))
        steps_per_chunk = -(-total_blocks // num_chunks)
        total_steps = num_chunks * steps_per_chunk
        num_full_blocks = rows // row_tile          # blocks fully in range
        needs_mask = num_full_blocks != total_steps

        def in_map(c, i):
            # Out-of-range steps of the last chunk (only when total_blocks is
            # not a multiple of num_chunks) re-read the final block and are
            # fully masked inside the kernel (zero contribution).
            return (jnp.minimum(c * steps_per_chunk + i, total_blocks - 1), 0)

        kernel = functools.partial(
            _loss_kernel, gan_type=gan_type, row_tile=row_tile,
            valid_rows=rows, steps_per_chunk=steps_per_chunk,
            num_full_blocks=num_full_blocks, needs_mask=needs_mask)

        partials = pl.pallas_call(
            kernel,
            out_shape=jax.ShapeDtypeStruct((num_chunks * 8, LANES), jnp.float32),
            grid_spec=pltpu.PrefetchScalarGridSpec(
                num_scalar_prefetch=0,
                grid=(num_chunks, steps_per_chunk),
                in_specs=[
                    pl.BlockSpec((row_tile, LANES), in_map),
                    pl.BlockSpec((row_tile, LANES), in_map),
                ],
                out_specs=pl.BlockSpec((8, LANES), lambda c, i: (c, 0)),
            ),
            compiler_params=pltpu.CompilerParams(
                dimension_semantics=("parallel", "arbitrary"),
                vmem_limit_bytes=VMEM_LIMIT_BYTES,
            ),
        )(p2d, g2d)

        total = total + jnp.sum(partials)

    if tail:
        tp = flat_p[rows * LANES:].astype(jnp.float32)
        tg = flat_g[rows * LANES:].astype(jnp.float32)
        total = total + jnp.sum(_elementwise_error(tp, tg, gan_type))

    return total * (1.0 / n)


def _bce_ref(pred, gt):
    return jnp.mean(
        -(gt * jnp.maximum(jnp.log(pred), -100.0)
          + (1.0 - gt) * jnp.maximum(jnp.log(1.0 - pred), -100.0)))


if __name__ == "__main__":
    key = jax.random.PRNGKey(0)
    k1, k2, k3, k4 = jax.random.split(key, 4)

    # Primary case: discriminator prediction map, NCHW [2, 4, 16, 16].
    B, C, H, W = 2, 4, 16, 16
    pred = jax.nn.sigmoid(jax.random.normal(k1, (B, C, H, W), jnp.float32))
    gt = jax.random.bernoulli(k2, 0.5, (B, C, H, W)).astype(jnp.float32)

    ls_loss = jax.block_until_ready(gan_loss(pred, gt, gan_type="ls"))
    bce_loss = jax.block_until_ready(gan_loss(pred, gt, gan_type="bce"))
    ls_ref = jnp.mean((pred - gt) ** 2)
    bce_ref = _bce_ref(pred, gt)
    assert jnp.allclose(ls_loss, ls_ref, rtol=1e-5, atol=1e-6), (ls_loss, ls_ref)
    assert jnp.allclose(bce_loss, bce_ref, rtol=1e-5, atol=1e-6), (bce_loss, bce_ref)

    # Secondary case (2*4*200*200 = 320000 elems = 2500 lane-rows):
    #  a) default config -> single big block, unmasked fast path;
    #  b) forced small tile + 2 chunks -> exercises the multi-block path, the
    #     partial-boundary-block row mask, and the clamped out-of-range step.
    B2, C2, H2, W2 = 2, 4, 200, 200
    pred2 = jax.nn.sigmoid(jax.random.normal(k3, (B2, C2, H2, W2), jnp.float32))
    gt2 = jax.random.bernoulli(k4, 0.5, (B2, C2, H2, W2)).astype(jnp.float32)
    ls_ref2 = jnp.mean((pred2 - gt2) ** 2)
    bce_ref2 = _bce_ref(pred2, gt2)

    ls2 = jax.block_until_ready(gan_loss(pred2, gt2, gan_type="ls"))
    bce2 = jax.block_until_ready(gan_loss(pred2, gt2, gan_type="bce"))
    assert jnp.allclose(ls2, ls_ref2, rtol=1e-4, atol=1e-6), (ls2, ls_ref2)
    assert jnp.allclose(bce2, bce_ref2, rtol=1e-4, atol=1e-6), (bce2, bce_ref2)

    ls2b = jax.block_until_ready(
        gan_loss(pred2, gt2, gan_type="ls", max_row_tile=1024, num_chunks=2))
    bce2b = jax.block_until_ready(
        gan_loss(pred2, gt2, gan_type="bce", max_row_tile=1024, num_chunks=2))
    assert jnp.allclose(ls2b, ls_ref2, rtol=1e-4, atol=1e-6), (ls2b, ls_ref2)
    assert jnp.allclose(bce2b, bce_ref2, rtol=1e-4, atol=1e-6), (bce2b, bce_ref2)

    print("KERNEL_OK")
</pallas_src>

<mosaic_0001>
module attributes {stable_mosaic.version = 11 : i64} {
  func.func @_loss_kernel(%arg0: i32, %arg1: i32, %arg2: memref<16x128xf32, #tpu.memory_space<vmem>>, %arg3: memref<16x128xf32, #tpu.memory_space<vmem>>, %arg4: memref<8x128xf32, #tpu.memory_space<vmem>>) attributes {dimension_semantics = [#tpu.dimension_semantics<parallel>, #tpu.dimension_semantics<arbitrary>], iteration_bounds = array<i64: 1, 1>, scalar_prefetch = 0 : i64, scratch_operands = 0 : i64, tpu.core_type = #tpu.core_type<tc>, window_params = [{transform_indices = @transform_0, window_bounds = array<i64: 16, 128>}, {transform_indices = @transform_1, window_bounds = array<i64: 16, 128>}, {transform_indices = @transform_2, window_bounds = array<i64: 8, 128>}]} {
    %c0_i32 = arith.constant 0 : i32
    %0 = arith.cmpi eq, %arg1, %c0_i32 : i32
    %1 = arith.extui %0 : i1 to i32
    %c0_i32_0 = arith.constant 0 : i32
    %2 = arith.cmpi ne, %1, %c0_i32_0 : i32
    scf.if %2 {
      %cst_8 = arith.constant 0.000000e+00 : f32
      %12 = vector.broadcast %cst_8 : f32 to vector<8x128xf32>
      %c0_9 = arith.constant 0 : index
      %c0_10 = arith.constant 0 : index
      %13 = vector.load %arg4[%c0_9, %c0_10] : memref<8x128xf32, #tpu.memory_space<vmem>>, vector<8x128xf32>
      tpu.vector_store %arg4[%c0_9, %c0_10], %12 {strides = array<i32>} : memref<8x128xf32, #tpu.memory_space<vmem>>, vector<8x128xf32>,
    } else {
    }
    %c0 = arith.constant 0 : index
    %c0_1 = arith.constant 0 : index
    %3 = vector.load %arg2[%c0, %c0_1] : memref<16x128xf32, #tpu.memory_space<vmem>>, vector<16x128xf32>
    %c0_2 = arith.constant 0 : index
    %c0_3 = arith.constant 0 : index
    %4 = vector.load %arg3[%c0_2, %c0_3] : memref<16x128xf32, #tpu.memory_space<vmem>>, vector<16x128xf32>
    %5 = arith.subf %3, %4 : vector<16x128xf32>
    %6 = arith.mulf %5, %5 : vector<16x128xf32>
    %c0_4 = arith.constant 0 : index
    %c0_5 = arith.constant 0 : index
    %7 = vector.load %arg4[%c0_4, %c0_5] : memref<8x128xf32, #tpu.memory_space<vmem>>, vector<8x128xf32>
    %8 = vector.shape_cast %6 : vector<16x128xf32> to vector<2x8x128xf32>
    %cst = arith.constant dense<0.000000e+00> : vector<8x128xf32>
    %9 = vector.multi_reduction <add>, %8, %cst [0] : vector<2x8x128xf32> to vector<8x128xf32>
    %10 = arith.addf %7, %9 : vector<8x128xf32>
    %c0_6 = arith.constant 0 : index
    %c0_7 = arith.constant 0 : index
    %11 = vector.load %arg4[%c0_6, %c0_7] : memref<8x128xf32, #tpu.memory_space<vmem>>, vector<8x128xf32>
    tpu.vector_store %arg4[%c0_6, %c0_7], %10 {strides = array<i32>} : memref<8x128xf32, #tpu.memory_space<vmem>>, vector<8x128xf32>,
    return
  }
  func.func @transform_0(%arg0: i32, %arg1: i32) -> (i32, i32) {
    %c1_i32 = arith.constant 1 : i32
    %0 = arith.muli %arg0, %c1_i32 : i32
    %1 = arith.addi %0, %arg1 : i32
    %c0_i32 = arith.constant 0 : i32
    %2 = arith.minsi %1, %c0_i32 : i32
    %c0_i32_0 = arith.constant 0 : i32
    %c0_i32_1 = arith.constant 0 : i32
    return %2, %c0_i32_0 : i32, i32
  }
  func.func @transform_1(%arg0: i32, %arg1: i32) -> (i32, i32) {
    %c1_i32 = arith.constant 1 : i32
    %0 = arith.muli %arg0, %c1_i32 : i32
    %1 = arith.addi %0, %arg1 : i32
    %c0_i32 = arith.constant 0 : i32
    %2 = arith.minsi %1, %c0_i32 : i32
    %c0_i32_0 = arith.constant 0 : i32
    %c0_i32_1 = arith.constant 0 : i32
    return %2, %c0_i32_0 : i32, i32
  }
  func.func @transform_2(%arg0: i32, %arg1: i32) -> (i32, i32) {
    %c0_i32 = arith.constant 0 : i32
    %c0_i32_0 = arith.constant 0 : i32
    return %arg0, %c0_i32 : i32, i32
  }
}

</mosaic_0001>

<bundles_post_ra>
// kernel: tpu_custom_call.1
= control target key start
LH: loop header
LB: loop body
LE: loop exit
PB: predicated region body
PF: predicated region fallthrough
CT: control target
= control target key end

     0   :  { %7 = vsyncpa [#allocation3], 0  ;;  %s231_s0 = inlined_call_operand.hbm [shape: f32[16,128], index: 0, kind: input, shape index: {}]   ;;  %s232_s1 = inlined_call_operand.hbm [shape: f32[16,128], index: 1, kind: input, shape index: {}]   ;;  %s233_s2 = inlined_call_operand.hbm [shape: f32[8,128], index: 2, kind: output, shape index: {}]  }
   0x1   :  { %8 = vsyncpa [#allocation6], 0 }
   0x2   :  { %9 = vsyncpa [#allocation4], 0  ;;  %s175_s9 = smov [#allocation2]   ;;  %s103_s13 = scalar_lea.hbm %s231_s0, 256 }
   0x3   :  { %s21_s10 = sshll.u32 %s175_s9, 4  ;;  %p104_p0 = scmp.ne.s32.totalorder %s231_s0, %s103_s13  ;;  %s22_s10 = int_to_ptr.vmem [resolvable:$true] %s21_s10 }
   0x4   :  { %p107_p1 = scmp.lt.u32.totalorder %s103_s13, %s231_s0 }
   0x6   :  { %p109_p2 = pnand %p107_p1, %p104_p0 }
   0x8   :  { %112 = shalt.err (!%p109_p2)
}
   0x9   :  { %s113_s18 = scalar_lea.vmem %s22_s10, 256  ;;  %p118_p4 = scmp.lt.s32.totalorder %s22_s10, %s22_s10 }
   0xa   :  { %p114_p3 = scmp.ne.s32.totalorder %s22_s10, %s113_s18  ;;  %p119_p5 = scmp.lt.s32.totalorder %s113_s18, %s113_s18 }
   0xc   :  { %p120_p6 = por %p119_p5, %p118_p4 }
   0xe   :  { %p121_p7 = pnand %p120_p6, %p114_p3 }
  0x10   :  { %124 = shalt.err (!%p121_p7)
}
  0x11   :  { %s176_s19 = smov 128   ;;  %s177_s20 = smov 8  }
  0x12   :  { %27 = dma.hbm_to_vmem [thread:$0]  %s231_s0, 256, %s22_s10, [#allocation3], %s176_s19, %s176_s19, %s177_s20  }
  0x13   :  { %s178_s23 = smov [#allocation5]   ;;  %s125_s27 = scalar_lea.hbm %s232_s1, 256 }
  0x14   :  { %s39_s24 = sshll.u32 %s178_s23, 4  ;;  %p126_p8 = scmp.ne.s32.totalorder %s232_s1, %s125_s27  ;;  %s40_s24 = int_to_ptr.vmem [resolvable:$true] %s39_s24 }
  0x15   :  { %p129_p9 = scmp.lt.u32.totalorder %s125_s27, %s232_s1 }
  0x17   :  { %p131_p10 = pnand %p129_p9, %p126_p8 }
  0x19   :  { %134 = shalt.err (!%p131_p10)
}
  0x1a   :  { %s135_s4 = scalar_lea.vmem %s40_s24, 256  ;;  %p140_p12 = scmp.lt.s32.totalorder %s40_s24, %s40_s24 }
  0x1b   :  { %p136_p11 = scmp.ne.s32.totalorder %s40_s24, %s135_s4  ;;  %p141_p13 = scmp.lt.s32.totalorder %s135_s4, %s135_s4 }
  0x1d   :  { %p142_p0 = por %p141_p13, %p140_p12 }
  0x1f   :  { %p143_p1 = pnand %p142_p0, %p136_p11 }
  0x21   :  { %146 = shalt.err (!%p143_p1)
}
  0x22   :  { %45 = dma.hbm_to_vmem [thread:$0]  %s232_s1, 256, %s40_s24, [#allocation6], %s176_s19, %s176_s19, %s177_s20  }
  0x23   :  { %169 = dma.done.wait [#allocation3], 256  }
  0x24   :  { %170 = vsyncadd [#allocation3], 4294967040 }
  0x25   :  { %171 = dma.done.wait [#allocation6], 256  }
  0x26   :  { %172 = vsyncadd [#allocation6], 4294967040  ;;  %v65_v0 = vld [vmem:[#allocation2] sm:$0xff]  ;;  %v66_v1 = vld [vmem:[#allocation2 + $0x8] sm:$0xff]  ;;  %s179_s6 = smov [#allocation7]  }
  0x27   :  { %v67_v2 = vld [vmem:[#allocation5] sm:$0xff]  ;;  %v68_v3 = vld [vmem:[#allocation5 + $0x8] sm:$0xff]  ;;  %s83_s7 = sshll.u32 %s179_s6, 4  ;;  %s84_s7 = int_to_ptr.vmem [resolvable:$true] %s83_s7 }
  0x28   :  { %v69_v4 = vsub.f32 %v65_v0, %v67_v2  ;;  %v70_v5 = vsub.f32 %v66_v1, %v68_v3  ;;  %s147_s8 = scalar_lea.vmem %s84_s7, 128  ;;  %p152_p3 = scmp.lt.s32.totalorder %s84_s7, %s84_s7 }
  0x29   :  { %p148_p2 = scmp.ne.s32.totalorder %s84_s7, %s147_s8  ;;  %p153_p4 = scmp.lt.s32.totalorder %s147_s8, %s147_s8 }
  0x2a   :  { %v71_v6 = vmul.f32 %v69_v4, %v69_v4  ;;  %v72_v7 = vmul.f32 %v70_v5, %v70_v5 }
  0x2b   :  { %p154_p5 = por %p153_p4, %p152_p3 }
  0x2c   :  { %v74_v8 = vadd.f32 %v72_v7, %v71_v6 }
  0x2d   :  { %p155_p6 = pnand %p154_p5, %p148_p2 }
  0x2e   :  { %76 = vst [vmem:[#allocation7] sm:$0xff] %v74_v8 }
  0x2f   :  { %158 = shalt.err (!%p155_p6)
}
  0x30   :  { %s159_s10 = scalar_lea.hbm %s233_s2, 128 }
  0x31   :  { %p160_p7 = scmp.ne.s32.totalorder %s233_s2, %s159_s10  ;;  %p163_p8 = scmp.lt.u32.totalorder %s159_s10, %s233_s2 }
  0x33   :  { %p165_p9 = pnand %p163_p8, %p160_p7 }
  0x35   :  { %168 = shalt.err (!%p165_p9)
}
  0x36   :  { %86 = dma.vmem_to_hbm [thread:$0]  %s84_s7, 128, %s233_s2, [#allocation4]  }
  0x37   :  { %173 = dma.done.wait [#allocation4], 128  }
  0x38   :  { %174 = vsyncadd [#allocation4], 4294967168 }
  0x39   :  { %90 = vsyncpa [#allocation3], 1 }
  0x3a   :  { %91 = vsyncpa [#allocation6], 1 }
  0x3b   :  { %92 = vsyncpa [#allocation4], 1 }

</bundles_post_ra>
